<compile_context>
chip_gen: v5e
topology: v5e:2x2
jax: 0.10.0
libtpu: 0.0.40
codegen_flags: <defaults>
</compile_context>

<pallas_src>
import jax
import jax.numpy as jnp
from jax.experimental import pallas as pl
from jax.experimental.pallas import tpu as pltpu


def _tv_kernel(x_ref, h_ref, w_ref):
    # x_ref: (TB, H, W) block of planes for this grid step.
    x = x_ref[...].astype(jnp.float32)

    dh = x[:, 1:, :] - x[:, :-1, :]   # vertical (height) differences
    dw = x[:, :, 1:] - x[:, :, :-1]   # horizontal (width) differences

    h_sum = jnp.sum(dh * dh)
    w_sum = jnp.sum(dw * dw)

    # One scalar reduce + broadcast per multi-MiB block: negligible cost,
    # and per-block outputs keep the grid axis fully parallel.
    h_ref[...] = jnp.full(h_ref.shape, h_sum, dtype=jnp.float32)
    w_ref[...] = jnp.full(w_ref.shape, w_sum, dtype=jnp.float32)


def tv_loss(x, tv_loss_weight=1.0):
    """Pallas implementation of TVLoss.forward for NCHW input `x`."""
    bz, c, h, w = x.shape
    p = bz * c
    x_flat = x.reshape(p, h, w)

    # Pack as many whole planes as fit in ~2 MiB per block (double-buffered
    # ~4 MiB, safe under v5e's 16 MiB default scoped VMEM and v7x's 64 MiB
    # physical VMEM).
    plane_bytes = h * w * x_flat.dtype.itemsize
    target_block_bytes = 2 * 1024 * 1024
    tb = int(max(1, min(p, target_block_bytes // max(plane_bytes, 1))))
    nb = (p + tb - 1) // tb

    # Zero-pad the plane axis up to nb*tb; zero planes add 0 to both sums.
    pad = nb * tb - p
    if pad:
        x_flat = jnp.concatenate(
            [x_flat, jnp.zeros((pad, h, w), dtype=x_flat.dtype)], axis=0
        )

    h_parts, w_parts = pl.pallas_call(
        _tv_kernel,
        out_shape=(
            jax.ShapeDtypeStruct((nb, 8, 128), jnp.float32),
            jax.ShapeDtypeStruct((nb, 8, 128), jnp.float32),
        ),
        grid_spec=pltpu.PrefetchScalarGridSpec(
            num_scalar_prefetch=0,
            grid=(nb,),
            in_specs=[pl.BlockSpec((tb, h, w), lambda i: (i, 0, 0))],
            out_specs=(
                pl.BlockSpec((1, 8, 128), lambda i: (i, 0, 0)),
                pl.BlockSpec((1, 8, 128), lambda i: (i, 0, 0)),
            ),
        ),
        compiler_params=pltpu.CompilerParams(
            dimension_semantics=("parallel",),
            vmem_limit_bytes=32 * 1024 * 1024,
        ),
    )(x_flat)

    h_tv = jnp.sum(h_parts[:, 0, 0])
    w_tv = jnp.sum(w_parts[:, 0, 0])

    # Same count convention as the PyTorch module: size(1)*size(2)*size(3).
    # (Divides by zero if h == 1 or w == 1, exactly like the reference.)
    count_h = c * (h - 1) * w
    count_w = c * h * (w - 1)

    return tv_loss_weight * 2.0 * (h_tv / count_h + w_tv / count_w) / bz


def _tv_loss_ref(x, tv_loss_weight=1.0):
    """Pure-JAX reference matching the PyTorch semantics exactly."""
    bz, c, h, w = x.shape
    x = x.astype(jnp.float32)
    h_tv = jnp.sum((x[:, :, 1:, :] - x[:, :, : h - 1, :]) ** 2)
    w_tv = jnp.sum((x[:, :, :, 1:] - x[:, :, :, : w - 1]) ** 2)
    count_h = c * (h - 1) * w
    count_w = c * h * (w - 1)
    return tv_loss_weight * 2.0 * (h_tv / count_h + w_tv / count_w) / bz


if __name__ == "__main__":
    key = jax.random.PRNGKey(0)
    x = jax.random.normal(key, (2, 4, 16, 16), dtype=jnp.float32)

    out = tv_loss(x, tv_loss_weight=1.0)
    out = jax.block_until_ready(out)

    ref = _tv_loss_ref(x, tv_loss_weight=1.0)
    assert jnp.allclose(out, ref, rtol=1e-5, atol=1e-5), (out, ref)

    print("KERNEL_OK")
</pallas_src>

<mosaic_0001>
module attributes {stable_mosaic.version = 11 : i64} {
  func.func @_tv_kernel(%arg0: i32, %arg1: memref<8x16x16xf32, #tpu.memory_space<vmem>>, %arg2: memref<1x8x128xf32, #tpu.memory_space<vmem>>, %arg3: memref<1x8x128xf32, #tpu.memory_space<vmem>>) attributes {dimension_semantics = [#tpu.dimension_semantics<parallel>], iteration_bounds = array<i64: 1>, scalar_prefetch = 0 : i64, scratch_operands = 0 : i64, tpu.core_type = #tpu.core_type<tc>, window_params = [{transform_indices = @transform_0, window_bounds = array<i64: 8, 16, 16>}, {transform_indices = @transform_1, window_bounds = array<i64: 1, 8, 128>}, {transform_indices = @transform_2, window_bounds = array<i64: 1, 8, 128>}]} {
    %c0 = arith.constant 0 : index
    %c0_0 = arith.constant 0 : index
    %c0_1 = arith.constant 0 : index
    %0 = vector.load %arg1[%c0, %c0_0, %c0_1] : memref<8x16x16xf32, #tpu.memory_space<vmem>>, vector<8x16x16xf32>
    %1 = vector.extract_strided_slice %0 {offsets = [0, 1, 0], sizes = [8, 15, 16], strides = [1, 1, 1]} : vector<8x16x16xf32> to vector<8x15x16xf32>
    %2 = vector.extract_strided_slice %0 {offsets = [0, 0, 0], sizes = [8, 15, 16], strides = [1, 1, 1]} : vector<8x16x16xf32> to vector<8x15x16xf32>
    %3 = arith.subf %1, %2 : vector<8x15x16xf32>
    %4 = vector.extract_strided_slice %0 {offsets = [0, 0, 1], sizes = [8, 16, 15], strides = [1, 1, 1]} : vector<8x16x16xf32> to vector<8x16x15xf32>
    %5 = vector.extract_strided_slice %0 {offsets = [0, 0, 0], sizes = [8, 16, 15], strides = [1, 1, 1]} : vector<8x16x16xf32> to vector<8x16x15xf32>
    %6 = arith.subf %4, %5 : vector<8x16x15xf32>
    %7 = arith.mulf %3, %3 : vector<8x15x16xf32>
    %8 = vector.shape_cast %7 : vector<8x15x16xf32> to vector<1x8x15x16xf32>
    %cst = arith.constant dense<0.000000e+00> : vector<1xf32>
    %9 = vector.multi_reduction <add>, %8, %cst [1, 2, 3] : vector<1x8x15x16xf32> to vector<1xf32>
    %10 = vector.shape_cast %9 : vector<1xf32> to vector<1x1x1x1xf32>
    %11 = vector.extract %10[0, 0, 0, 0] : f32 from vector<1x1x1x1xf32>
    %12 = arith.mulf %6, %6 : vector<8x16x15xf32>
    %13 = vector.shape_cast %12 : vector<8x16x15xf32> to vector<1x8x16x15xf32>
    %cst_2 = arith.constant dense<0.000000e+00> : vector<1xf32>
    %14 = vector.multi_reduction <add>, %13, %cst_2 [1, 2, 3] : vector<1x8x16x15xf32> to vector<1xf32>
    %15 = vector.shape_cast %14 : vector<1xf32> to vector<1x1x1x1xf32>
    %16 = vector.extract %15[0, 0, 0, 0] : f32 from vector<1x1x1x1xf32>
    %17 = vector.broadcast %11 : f32 to vector<1x8x128xf32>
    %c0_3 = arith.constant 0 : index
    %c0_4 = arith.constant 0 : index
    %c0_5 = arith.constant 0 : index
    %18 = vector.load %arg2[%c0_3, %c0_4, %c0_5] : memref<1x8x128xf32, #tpu.memory_space<vmem>>, vector<1x8x128xf32>
    tpu.vector_store %arg2[%c0_3, %c0_4, %c0_5], %17 {strides = array<i32>} : memref<1x8x128xf32, #tpu.memory_space<vmem>>, vector<1x8x128xf32>,
    %19 = vector.broadcast %16 : f32 to vector<1x8x128xf32>
    %c0_6 = arith.constant 0 : index
    %c0_7 = arith.constant 0 : index
    %c0_8 = arith.constant 0 : index
    %20 = vector.load %arg3[%c0_6, %c0_7, %c0_8] : memref<1x8x128xf32, #tpu.memory_space<vmem>>, vector<1x8x128xf32>
    tpu.vector_store %arg3[%c0_6, %c0_7, %c0_8], %19 {strides = array<i32>} : memref<1x8x128xf32, #tpu.memory_space<vmem>>, vector<1x8x128xf32>,
    return
  }
  func.func @transform_0(%arg0: i32) -> (i32, i32, i32) {
    %c0_i32 = arith.constant 0 : i32
    %c0_i32_0 = arith.constant 0 : i32
    %c0_i32_1 = arith.constant 0 : i32
    return %arg0, %c0_i32, %c0_i32_0 : i32, i32, i32
  }
  func.func @transform_1(%arg0: i32) -> (i32, i32, i32) {
    %c0_i32 = arith.constant 0 : i32
    %c0_i32_0 = arith.constant 0 : i32
    %c0_i32_1 = arith.constant 0 : i32
    return %arg0, %c0_i32, %c0_i32_0 : i32, i32, i32
  }
  func.func @transform_2(%arg0: i32) -> (i32, i32, i32) {
    %c0_i32 = arith.constant 0 : i32
    %c0_i32_0 = arith.constant 0 : i32
    %c0_i32_1 = arith.constant 0 : i32
    return %arg0, %c0_i32, %c0_i32_0 : i32, i32, i32
  }
}

</mosaic_0001>

<bundles_post_ra>
// kernel: tpu_custom_call.1
= control target key start
LH: loop header
LB: loop body
LE: loop exit
PB: predicated region body
PF: predicated region fallthrough
CT: control target
= control target key end

     0   :  { %8 = vsyncpa [#allocation3], 0  ;;  %s734_s0 = inlined_call_operand.hbm [shape: f32[8,16,16], index: 0, kind: input, shape index: {}]   ;;  %s735_s1 = inlined_call_operand.hbm [shape: f32[1,8,128], index: 1, kind: output, shape index: {0}]   ;;  %s736_s2 = inlined_call_operand.hbm [shape: f32[1,8,128], index: 2, kind: output, shape index: {1}]  }
   0x1   :  { %9 = vsyncpa [#allocation4], 0 }
   0x2   :  { %10 = vsyncpa [#allocation7], 0  ;;  %s15_s11 = sshll.u32 %s734_s0, 4  ;;  %s543_s12 = smov [#allocation2]   ;;  %s16_s11 = int_to_ptr.hbm [resolvable:$true] %s15_s11 }
   0x3   :  { %s17_s13 = sshll.u32 %s543_s12, 4  ;;  %s544_s14 = smov 128   ;;  %s18_s13 = int_to_ptr.vmem [resolvable:$true] %s17_s13 }
   0x4   :  { %s545_s15 = smov 8  }
   0x5   :  { %23 = dma.hbm_to_vmem [thread:$0]  %s16_s11, 2048, %s18_s13, [#allocation3], %s544_s14, %s544_s14, %s545_s15  }
   0x6   :  { %537 = dma.done.wait [#allocation3], 2048  }
   0x7   :  { %538 = vsyncadd [#allocation3], 4294965248  ;;  %v568_v0 = vld [vmem:[#allocation2 + $0x10] sm:$0xff]  ;;  %v570_v1 = vld [vmem:[#allocation2] sm:$0xff]  ;;  %s546_s16 = smov 1   ;;  %s547_s0 = smov 127  }
   0x8   :  { %121 = vrot.lane.b32.xlu1 %v568_v0, %s546_s16  ;;  %117 = vrot.lane.b32.xlu0 %v570_v1, %s546_s16  ;;  %v574_v2 = vld [vmem:[#allocation2 + $0x20] sm:$0xff]  ;;  %v577_v3 = vld [vmem:[#allocation2 + $0x18] sm:$0xff]  ;;  %v579_v4 = vld [vmem:[#allocation2 + $0x8] sm:$0xff]  ;;  %vm60_vm0 = vcmask 1040384   ;;  %vm213_vm1 = vcmask 1046528   ;;  %vm254_vm2 = vcmask 130048  }
   0x9   :  { %125 = vrot.lane.b32.xlu2 %v574_v2, %s546_s16  ;;  %v581_v5 = vld [vmem:[#allocation2 + $0x28] sm:$0xff]  ;;  %v586_v6 = vld [vmem:[#allocation2 + $0x30] sm:$0xff]  ;;  %v588_v7 = vld [vmem:[#allocation2 + $0x38] sm:$0xff]  ;;  %vm256_vm3 = vcmask 129024   ;;  %vm376_vm4 = vcmask 121856   ;;  %s548_s17 = smov [#allocation5]  }
   0xa   :  { %v590_v8 = vld [vmem:[#allocation2 + $0x40] sm:$0xff]  ;;  %v595_v9 = vld [vmem:[#allocation2 + $0x48] sm:$0xff]  ;;  %v597_v10 = vld [vmem:[#allocation2 + $0x50] sm:$0xff]  ;;  %s426_s18 = sshll.u32 %s548_s17, 4  ;;  %s428_s21 = sshll.u32 %s735_s1, 4  ;;  %s427_s18 = int_to_ptr.vmem [resolvable:$true] %s426_s18  ;;  %s429_s21 = int_to_ptr.hbm [resolvable:$true] %s428_s21 }
   0xb   :  { %v599_v11 = vld [vmem:[#allocation2 + $0x58] sm:$0xff]  ;;  %v604_v12 = vld [vmem:[#allocation2 + $0x60] sm:$0xff]  ;;  %v606_v13 = vld [vmem:[#allocation2 + $0x68] sm:$0xff]  ;;  %s549_s23 = smov [#allocation6]   ;;  %s439_s27 = sshll.u32 %s736_s2, 4  ;;  %s440_s27 = int_to_ptr.hbm [resolvable:$true] %s439_s27 }
   0xc   :  { %v608_v14 = vld [vmem:[#allocation2 + $0x70] sm:$0xff]  ;;  %v613_v15 = vld [vmem:[#allocation2 + $0x78] sm:$0xff]  ;;  %s437_s24 = sshll.u32 %s549_s23, 4  ;;  %s438_s24 = int_to_ptr.vmem [resolvable:$true] %s437_s24 }
  0x10   :  { %123 = vrot.lane.b32.xlu1 %v577_v3, %s546_s16  ;;  %119 = vrot.lane.b32.xlu0 %v579_v4, %s546_s16 }
  0x11   :  { %127 = vrot.lane.b32.xlu2 %v581_v5, %s546_s16 }
  0x18   :  { %129 = vrot.lane.b32.xlu0 %v586_v6, %s546_s16  ;;  %131 = vrot.lane.b32.xlu1 %v588_v7, %s546_s16 }
  0x19   :  { %133 = vrot.lane.b32.xlu2 %v590_v8, %s546_s16 }
  0x20   :  { %135 = vrot.lane.b32.xlu0 %v595_v9, %s546_s16  ;;  %137 = vrot.lane.b32.xlu1 %v597_v10, %s546_s16 }
  0x21   :  { %139 = vrot.lane.b32.xlu2 %v599_v11, %s546_s16 }
  0x28   :  { %141 = vrot.lane.b32.xlu0 %v604_v12, %s546_s16  ;;  %143 = vrot.lane.b32.xlu1 %v606_v13, %s546_s16 }
  0x29   :  { %145 = vrot.lane.b32.xlu2 %v608_v14, %s546_s16 }
  0x30   :  { %147 = vrot.lane.b32.xlu0 %v613_v15, %s546_s16 }
  0x63   :  { %v126_v16 = vpop.permute.xlu2 %125 }
  0x64   :  { %v169_v34 = vsub.f32 %v574_v2, %v126_v16  ;;  %v61_v16 = vrot.slane %v570_v1, 7 }
  0x66   :  { %v300_v40 = vmul.f32 %v169_v34, %v169_v34 }
  0x6b   :  { %v128_v17 = vpop.permute.xlu2 %127 }
  0x6c   :  { %v170_v24 = vsub.f32 %v581_v5, %v128_v17  ;;  %v62_v17 = vrot.slane %v579_v4, 7 }
  0x6e   :  { %v301_v30 = vmul.f32 %v170_v24, %v170_v24 }
  0x73   :  { %v134_v25 = vpop.permute.xlu2 %133 }
  0x74   :  { %v173_v33 = vsub.f32 %v590_v8, %v134_v25 }
  0x76   :  { %v304_v39 = vmul.f32 %v173_v33, %v173_v33 }
  0x7a   :  { %v122_v18 = vpop.permute.xlu1 %121  ;;  %v118_v19 = vpop.permute.xlu0 %117 }
  0x7b   :  { %v167_v20 = vsub.f32 %v568_v0, %v122_v18  ;;  %v165_v21 = vsub.f32 %v570_v1, %v118_v19  ;;  %v140_v38 = vpop.permute.xlu2 %139  ;;  %v64_v18 = vrot.slane %v568_v0, 7  ;;  %v65_v19 = vrot.slane %v577_v3, 7 }
  0x7c   :  { %v176_v43 = vsub.f32 %v599_v11, %v140_v38 }
  0x7d   :  { %v298_v22 = vmul.f32 %v167_v20, %v167_v20  ;;  %v296_v23 = vmul.f32 %v165_v21, %v165_v21  ;;  %v63_v20 = vsel %vm60_vm0, %v61_v16, %v62_v17  ;;  %v101_v21 = vsub.f32 %v570_v1, %v61_v16 }
  0x7e   :  { %v307_v48 = vmul.f32 %v176_v43, %v176_v43  ;;  %v103_v24 = vsub.f32 %v568_v0, %v64_v18 }
  0x7f   :  { %332 = vrot.lane.b32.xlu0 %v298_v22, %s547_s0  ;;  %328 = vrot.lane.b32.xlu1 %v296_v23, %s547_s0  ;;  %v102_v22 = vsub.f32 %v579_v4, %v63_v20  ;;  %v66_v23 = vsel %vm60_vm0, %v64_v18, %v65_v19  ;;  %v181_v25 = vmul.f32 %v101_v21, %v101_v21 }
  0x82   :  { %v124_v26 = vpop.permute.xlu1 %123  ;;  %v120_v27 = vpop.permute.xlu0 %119 }
  0x83   :  { %v168_v28 = vsub.f32 %v577_v3, %v124_v26  ;;  %v166_v29 = vsub.f32 %v579_v4, %v120_v27  ;;  %v146_v50 = vpop.permute.xlu2 %145  ;;  %v104_v26 = vsub.f32 %v577_v3, %v66_v23  ;;  %v182_v27 = vmul.f32 %v102_v22, %v102_v22 }
  0x84   :  { %v179_v52 = vsub.f32 %v608_v14, %v146_v50 }
  0x85   :  { %v299_v31 = vmul.f32 %v168_v28, %v168_v28  ;;  %v297_v32 = vmul.f32 %v166_v29, %v166_v29  ;;  %v67_v28 = vrot.slane %v574_v2, 7  ;;  %v68_v29 = vrot.slane %v581_v5, 7 }
  0x86   :  { %v310_v56 = vmul.f32 %v179_v52, %v179_v52  ;;  %v215_v33 = vrot.slane %v182_v27, 1 }
  0x87   :  { %334 = vrot.lane.b32.xlu1 %v299_v31, %s547_s0  ;;  %330 = vrot.lane.b32.xlu2 %v297_v32, %s547_s0  ;;  %v214_v31 = vrot.slane %v181_v25, 1  ;;  %v184_v32 = vmul.f32 %v104_v26, %v104_v26  ;;  %v69_v1 = vsel %vm60_vm0, %v67_v28, %v68_v29  ;;  %v105_v4 = vsub.f32 %v574_v2, %v67_v28 }
  0x88   :  { %338 = vrot.lane.b32.xlu0 %v301_v30, %s547_s0  ;;  %v183_v30 = vmul.f32 %v103_v24, %v103_v24  ;;  %v79_v24 = vrot.slane %v604_v12, 7  ;;  %v80_v25 = vrot.slane %v606_v13, 7 }
  0x89   :  { %v218_v34 = vrot.slane %v184_v32, 1  ;;  %v216_v3 = vsel %vm213_vm1, %v214_v31, %v215_v33 }
  0x8a   :  { %v130_v35 = vpop.permute.xlu0 %129  ;;  %v132_v36 = vpop.permute.xlu1 %131  ;;  %v217_v0 = vrot.slane %v183_v30, 1  ;;  %v255_v38 = vsel %vm254_vm2, %v216_v3, 0.0  ;;  %v81_v31 = vsel %vm60_vm0, %v79_v24, %v80_v25  ;;  %v113_v32 = vsub.f32 %v604_v12, %v79_v24 }
  0x8b   :  { %v171_v37 = vsub.f32 %v586_v6, %v130_v35  ;;  %v172_v42 = vsub.f32 %v588_v7, %v132_v36  ;;  %v106_v35 = vsub.f32 %v581_v5, %v69_v1  ;;  %v70_v36 = vrot.slane %v586_v6, 7 }
  0x8d   :  { %v302_v41 = vmul.f32 %v171_v37, %v171_v37  ;;  %v303_v47 = vmul.f32 %v172_v42, %v172_v42  ;;  %v71_v37 = vrot.slane %v588_v7, 7  ;;  %v186_v42 = vmul.f32 %v106_v35, %v106_v35 }
  0x8f   :  { %336 = vrot.lane.b32.xlu2 %v300_v40, %s547_s0  ;;  %340 = vrot.lane.b32.xlu1 %v302_v41, %s547_s0  ;;  %v219_v40 = vsel %vm213_vm1, %v217_v0, %v218_v34  ;;  %v185_v41 = vmul.f32 %v105_v4, %v105_v4  ;;  %v72_v2 = vsel %vm60_vm0, %v70_v36, %v71_v37 }
  0x90   :  { %344 = vrot.lane.b32.xlu0 %v304_v39, %s547_s0  ;;  %v257_v39 = vsel %vm256_vm3, %v215_v33, 0.0  ;;  %v114_v0 = vsub.f32 %v606_v13, %v81_v31 }
  0x91   :  { %v258_v43 = vadd.f32 %v257_v39, %v255_v38  ;;  %v220_v5 = vrot.slane %v185_v41, 1 }
  0x92   :  { %v136_v44 = vpop.permute.xlu0 %135  ;;  %v138_v45 = vpop.permute.xlu1 %137  ;;  %v194_v38 = vmul.f32 %v114_v0, %v114_v0 }
  0x93   :  { %v174_v46 = vsub.f32 %v595_v9, %v136_v44  ;;  %v175_v51 = vsub.f32 %v597_v10, %v138_v45  ;;  %v259_v44 = vsel %vm254_vm2, %v219_v40, 0.0  ;;  %v107_v45 = vsub.f32 %v586_v6, %v70_v36 }
  0x94   :  { %v260_v50 = vadd.f32 %v259_v44, %v258_v43  ;;  %v83_v36 = vrot.slane %v613_v15, 7  ;;  %v233_v44 = vrot.slane %v194_v38, 1 }
  0x95   :  { %v305_v49 = vmul.f32 %v174_v46, %v174_v46  ;;  %v306_v55 = vmul.f32 %v175_v51, %v175_v51  ;;  %v221_v46 = vrot.slane %v186_v42, 1  ;;  %v261_v51 = vsel %vm256_vm3, %v218_v34, 0.0 }
  0x96   :  { %v187_v52 = vmul.f32 %v107_v45, %v107_v45  ;;  %v193_v34 = vmul.f32 %v113_v32, %v113_v32 }
  0x97   :  { %346 = vrot.lane.b32.xlu1 %v305_v49, %s547_s0  ;;  %342 = vrot.lane.b32.xlu2 %v303_v47, %s547_s0  ;;  %v108_v47 = vsub.f32 %v588_v7, %v72_v2  ;;  %v73_v49 = vrot.slane %v590_v8, 7 }
  0x98   :  { %350 = vrot.lane.b32.xlu0 %v307_v48, %s547_s0  ;;  %v74_v48 = vrot.slane %v595_v9, 7  ;;  %v232_v39 = vrot.slane %v193_v34, 1 }
  0x99   :  { %v109_v7 = vsub.f32 %v590_v8, %v73_v49 }
  0x9a   :  { %v142_v53 = vpop.permute.xlu0 %141  ;;  %v144_v57 = vpop.permute.xlu1 %143 }
  0x9b   :  { %v177_v54 = vsub.f32 %v604_v12, %v142_v53  ;;  %v178_v59 = vsub.f32 %v606_v13, %v144_v57  ;;  %v222_v53 = vsel %vm213_vm1, %v220_v5, %v221_v46  ;;  %v223_v57 = vrot.slane %v187_v52, 1 }
  0x9c   :  { %v263_v6 = vsel %vm254_vm2, %v222_v53, 0.0  ;;  %v189_v17 = vmul.f32 %v109_v7, %v109_v7  ;;  %v281_v52 = vsel %vm256_vm3, %v233_v44, 0.0 }
  0x9d   :  { %v308_v58 = vmul.f32 %v177_v54, %v177_v54  ;;  %v309_v62 = vmul.f32 %v178_v59, %v178_v59  ;;  %v188_v54 = vmul.f32 %v108_v47, %v108_v47  ;;  %v234_v47 = vsel %vm213_vm1, %v232_v39, %v233_v44 }
  0x9e   :  { %v226_v22 = vrot.slane %v189_v17, 1 }
  0x9f   :  { %352 = vrot.lane.b32.xlu1 %v308_v58, %s547_s0  ;;  %348 = vrot.lane.b32.xlu2 %v306_v55, %s547_s0  ;;  %v75_v55 = vsel %vm60_vm0, %v73_v49, %v74_v48  ;;  %v224_v58 = vrot.slane %v188_v54, 1  ;;  %v279_v49 = vsel %vm254_vm2, %v234_v47, 0.0 }
  0xa0   :  { %356 = vrot.lane.b32.xlu0 %v310_v56, %s547_s0  ;;  %v262_v56 = vadd.f32 %v261_v51, %v260_v50  ;;  %v110_v59 = vsub.f32 %v595_v9, %v75_v55 }
  0xa1   :  { %v225_v16 = vsel %vm213_vm1, %v223_v57, %v224_v58  ;;  %v269_v27 = vsel %vm256_vm3, %v224_v58, 0.0 }
  0xa2   :  { %v148_v60 = vpop.permute.xlu0 %147  ;;  %v190_v18 = vmul.f32 %v110_v59, %v110_v59  ;;  %v267_v21 = vsel %vm254_vm2, %v225_v16, 0.0 }
  0xa3   :  { %v180_v61 = vsub.f32 %v613_v15, %v148_v60  ;;  %v76_v60 = vrot.slane %v597_v10, 7 }
  0xa4   :  { %v227_v8 = vrot.slane %v190_v18, 1 }
  0xa5   :  { %v311_v63 = vmul.f32 %v180_v61, %v180_v61  ;;  %v77_v61 = vrot.slane %v599_v11, 7  ;;  %v111_v9 = vsub.f32 %v597_v10, %v76_v60  ;;  %v82_v10 = vrot.slane %v608_v14, 7 }
  0xa6   :  { %v228_v28 = vsel %vm213_vm1, %v226_v22, %v227_v8  ;;  %v273_v12 = vsel %vm256_vm3, %v227_v8, 0.0 }
  0xa7   :  { %358 = vrot.lane.b32.xlu1 %v311_v63, %s547_s0  ;;  %354 = vrot.lane.b32.xlu2 %v309_v62, %s547_s0  ;;  %v264_v62 = vadd.f32 %v263_v6, %v262_v56  ;;  %v265_v63 = vsel %vm256_vm3, %v221_v46, 0.0  ;;  %v78_v19 = vsel %vm60_vm0, %v76_v60, %v77_v61  ;;  %v191_v29 = vmul.f32 %v111_v9, %v111_v9 }
  0xa8   :  { %v112_v23 = vsub.f32 %v599_v11, %v78_v19  ;;  %v271_v11 = vsel %vm254_vm2, %v228_v28, 0.0  ;;  %v115_v35 = vsub.f32 %v608_v14, %v82_v10  ;;  %v84_v2 = vsel %vm60_vm0, %v82_v10, %v83_v36 }
  0xa9   :  { %v266_v20 = vadd.f32 %v265_v63, %v264_v62  ;;  %v229_v1 = vrot.slane %v191_v29, 1  ;;  %v116_v13 = vsub.f32 %v613_v15, %v84_v2 }
  0xaa   :  { %v192_v30 = vmul.f32 %v112_v23, %v112_v23  ;;  %v195_v40 = vmul.f32 %v115_v35, %v115_v35 }
  0xab   :  { %v268_v26 = vadd.f32 %v267_v21, %v266_v20  ;;  %v196_v46 = vmul.f32 %v116_v13, %v116_v13 }
  0xac   :  { %v230_v4 = vrot.slane %v192_v30, 1  ;;  %v235_v5 = vrot.slane %v195_v40, 1 }
  0xad   :  { %v270_v33 = vadd.f32 %v269_v27, %v268_v26  ;;  %v236_v50 = vrot.slane %v196_v46, 1 }
  0xae   :  { %v231_v37 = vsel %vm213_vm1, %v229_v1, %v230_v4  ;;  %v277_v14 = vsel %vm256_vm3, %v230_v4, 0.0 }
  0xaf   :  { %v272_v3 = vadd.f32 %v271_v11, %v270_v33  ;;  %v275_v43 = vsel %vm254_vm2, %v231_v37, 0.0  ;;  %v237_v54 = vsel %vm213_vm1, %v235_v5, %v236_v50  ;;  %v285_v59 = vsel %vm256_vm3, %v236_v50, 0.0 }
  0xb0   :  { %v283_v6 = vsel %vm254_vm2, %v237_v54, 0.0 }
  0xb1   :  { %v274_v42 = vadd.f32 %v273_v12, %v272_v3 }
  0xb3   :  { %v276_v45 = vadd.f32 %v275_v43, %v274_v42 }
  0xb5   :  { %v278_v48 = vadd.f32 %v277_v14, %v276_v45 }
  0xb7   :  { %v280_v51 = vadd.f32 %v279_v49, %v278_v48 }
  0xb9   :  { %v282_v15 = vadd.f32 %v281_v52, %v280_v51 }
  0xbb   :  { %v284_v58 = vadd.f32 %v283_v6, %v282_v15 }
  0xbd   :  { %v286_v61 = vadd.f32 %v285_v59, %v284_v58 }
  0xd0   :  { %287 = vadd.xlane.f32.xlu2 %v286_v61 }
  0xe1   :  { %v331_v41 = vpop.permute.xlu2 %330 }
  0xe2   :  { %v378_v7 = vsel %vm376_vm4, %v331_v41, 0.0 }
  0xe9   :  { %v337_v57 = vpop.permute.xlu2 %336 }
  0xea   :  { %v384_v21 = vsel %vm376_vm4, %v337_v57, 0.0 }
  0xf1   :  { %v329_v53 = vpop.permute.xlu1 %328  ;;  %v333_v56 = vpop.permute.xlu0 %332 }
  0xf2   :  { %v377_v55 = vsel %vm376_vm4, %v329_v53, 0.0  ;;  %v380_v62 = vsel %vm376_vm4, %v333_v56, 0.0  ;;  %v343_v20 = vpop.permute.xlu2 %342 }
  0xf3   :  { %v379_v60 = vadd.f32 %v378_v7, %v377_v55  ;;  %v390_v25 = vsel %vm376_vm4, %v343_v20, 0.0 }
  0xf5   :  { %v381_v63 = vadd.f32 %v380_v62, %v379_v60 }
  0xf9   :  { %v335_v16 = vpop.permute.xlu1 %334 }
  0xfa   :  { %v382_v17 = vsel %vm376_vm4, %v335_v16, 0.0  ;;  %v339_v18 = vpop.permute.xlu0 %338  ;;  %v349_v29 = vpop.permute.xlu2 %348 }
  0xfb   :  { %v383_v19 = vadd.f32 %v382_v17, %v381_v63  ;;  %v386_v8 = vsel %vm376_vm4, %v339_v18, 0.0  ;;  %v396_v10 = vsel %vm376_vm4, %v349_v29, 0.0 }
  0xfd   :  { %v385_v22 = vadd.f32 %v384_v21, %v383_v19 }
  0xff   :  { %v387_v9 = vadd.f32 %v386_v8, %v385_v22 }
 0x101   :  { %v341_v23 = vpop.permute.xlu1 %340 }
 0x102   :  { %v388_v24 = vsel %vm376_vm4, %v341_v23, 0.0  ;;  %v345_v26 = vpop.permute.xlu0 %344  ;;  %v355_v34 = vpop.permute.xlu2 %354 }
 0x103   :  { %v389_v27 = vadd.f32 %v388_v24, %v387_v9  ;;  %v392_v30 = vsel %vm376_vm4, %v345_v26, 0.0  ;;  %v402_v37 = vsel %vm376_vm4, %v355_v34, 0.0 }
 0x105   :  { %v391_v28 = vadd.f32 %v390_v25, %v389_v27 }
 0x107   :  { %v393_v31 = vadd.f32 %v392_v30, %v391_v28 }
 0x109   :  { %v347_v32 = vpop.permute.xlu1 %346 }
 0x10a   :  { %v394_v33 = vsel %vm376_vm4, %v347_v32, 0.0  ;;  %v351_v11 = vpop.permute.xlu0 %350 }
 0x10b   :  { %v395_v1 = vadd.f32 %v394_v33, %v393_v31  ;;  %v398_v0 = vsel %vm376_vm4, %v351_v11, 0.0 }
 0x10d   :  { %v397_v4 = vadd.f32 %v396_v10, %v395_v1 }
 0x10f   :  { %v399_v3 = vadd.f32 %v398_v0, %v397_v4 }
 0x111   :  { %v353_v35 = vpop.permute.xlu1 %352 }
 0x112   :  { %v400_v36 = vsel %vm376_vm4, %v353_v35, 0.0  ;;  %v357_v12 = vpop.permute.xlu0 %356 }
 0x113   :  { %v401_v38 = vadd.f32 %v400_v36, %v399_v3  ;;  %v404_v40 = vsel %vm376_vm4, %v357_v12, 0.0 }
 0x115   :  { %v403_v39 = vadd.f32 %v402_v37, %v401_v38 }
 0x117   :  { %v405_v41 = vadd.f32 %v404_v40, %v403_v39 }
 0x119   :  { %v359_v42 = vpop.permute.xlu1 %358 }
 0x11a   :  { %v406_v2 = vsel %vm376_vm4, %v359_v42, 0.0 }
 0x11b   :  { %v407_v43 = vadd.f32 %v406_v2, %v405_v41 }
 0x11d   :  { %408 = vadd.xlane.f32.xlu0 %v407_v43 }
 0x143   :  { %v288_v13 = vpop.xlane.xlu2 %287 }
 0x144   :  { %v289_v44 = vrot.slane %v288_v13, 4 }
 0x146   :  { %v290_v45 = vadd.f32 %v289_v44, %v288_v13 }
 0x148   :  { %v291_v14 = vrot.slane %v290_v45, 2 }
 0x14a   :  { %v292_v5 = vadd.f32 %v291_v14, %v290_v45 }
 0x14c   :  { %v293_v46 = vrot.slane %v292_v5, 1 }
 0x14e   :  { %v294_v47 = vadd.f32 %v293_v46, %v292_v5 }
 0x150   :  { %454 = vpush %v294_v47 }
 0x181   :  { %s455_s22 = spop %454 }
 0x182   :  { %v417_v15 = vstv %s455_s22 }
 0x183   :  { %418 = vst [vmem:[#allocation5] sm:$0xff] %v417_v15 }
 0x184   :  { %431 = dma.vmem_to_hbm [thread:$0]  %s427_s18, 128, %s429_s21, [#allocation4]  }
 0x190   :  { %v409_v48 = vpop.xlane.xlu0 %408 }
 0x191   :  { %v410_v49 = vrot.slane %v409_v48, 4 }
 0x193   :  { %v411_v50 = vadd.f32 %v410_v49, %v409_v48 }
 0x195   :  { %v412_v51 = vrot.slane %v411_v50, 2 }
 0x197   :  { %v413_v52 = vadd.f32 %v412_v51, %v411_v50 }
 0x199   :  { %v414_v53 = vrot.slane %v413_v52, 1 }
 0x19b   :  { %v415_v54 = vadd.f32 %v414_v53, %v413_v52 }
 0x19d   :  { %456 = vpush %v415_v54 }
 0x1ce   :  { %s457_s28 = spop %456 }
 0x1cf   :  { %v419_v55 = vstv %s457_s28 }
 0x1d0   :  { %420 = vst [vmem:[#allocation6] sm:$0xff] %v419_v55 }
 0x1d1   :  { %442 = dma.vmem_to_hbm [thread:$0]  %s438_s24, 128, %s440_s27, [#allocation7]  }
 0x1d2   :  { %539 = dma.done.wait [#allocation4], 128  }
 0x1d3   :  { %540 = vsyncadd [#allocation4], 4294967168 }
 0x1d4   :  { %541 = dma.done.wait [#allocation7], 128  }
 0x1d5   :  { %542 = vsyncadd [#allocation7], 4294967168 }
 0x1d6   :  { %451 = vsyncpa [#allocation3], 1 }
 0x1d7   :  { %452 = vsyncpa [#allocation4], 1 }
 0x1d8   :  { %453 = vsyncpa [#allocation7], 1 }

</bundles_post_ra>
